<compile_context>
chip_gen: v7x
topology: tpu7x:2x2x1
jax: 0.10.0
libtpu: 0.0.40
codegen_flags: <defaults>
</compile_context>

<pallas_src>
import math

import jax
import jax.numpy as jnp
from jax.experimental import pallas as pl
from jax.experimental.pallas import tpu as pltpu


class CONSTANTS:
    BATCH_DIM_CAT_VAR_CONST = 1


# Per *input* buffer tile size.  Only the input is double-buffered by the BlockSpec
# pipeline (the output side is a manual DMA fan-out straight from the input block),
# so steady-state pipelined VMEM ~= 2 * _TILE_BYTES = 16 MiB: fine on v5e/v6e
# (128 MiB physical) and on v7x (64 MiB physical, 32 MiB default scoped).
_TILE_BYTES = 8 * 1024 * 1024

# Below this output size, XLA's fused copy beats the fixed pallas_call launch cost
# plus ~0.35 us per grid step.
_XLA_FASTPATH_OUT_BYTES = 1 * 1024 * 1024

# Explicit scoped-VMEM limit: >= default on v5e (16 MiB) / v6e,v7x (32 MiB), and still
# leaves headroom on v7x's 64 MiB physical VMEM.
_VMEM_LIMIT_BYTES = 48 * 1024 * 1024


def _pick_lane_cols(total: int):
    """Largest power-of-two multiple of 128 (capped at 1024) dividing `total`.

    Returns None if `total` is not a multiple of 128 (non-lane-dense; XLA fallback).
    """
    if total <= 0 or total % 128 != 0:
        return None
    cols = 128
    while cols * 2 <= 1024 and total % (cols * 2) == 0:
        cols *= 2
    return cols


def _pick_row_tile(rows: int, cols: int, itemsize: int, tile_bytes: int) -> int:
    """Row tile for the flattened (rows, cols) view.

    Targets ~tile_bytes per block; keeps the sublane dim a multiple of the packed
    sublane size (8 for 32-bit, 16 for 16-bit, 32 for 8-bit) or equal to the full
    row count (exempt from the (8,128) rule).
    """
    sub = 8 * max(1, 4 // max(1, itemsize))
    row_bytes = cols * itemsize
    budget = max(1, tile_bytes // row_bytes)
    if budget >= rows:
        return rows
    return min(rows, max(sub, (budget // sub) * sub))


def _make_fanout_kernel(repeat: int, rows: int, row_tile: int, n_full: int, tail: int):
    """Kernel: for grid step i, DMA the current input block to `repeat` HBM slots."""

    def kernel(t_ref, o_ref, sem):
        # t_ref: (row_tile, cols) VMEM block of the constant (auto-pipelined).
        # o_ref: (repeat * rows, cols) raw HBM ref (memory_space=pl.ANY).
        i = pl.program_id(0)

        def fan_out(nrows):
            off = pl.multiple_of(i * row_tile, row_tile)
            src = t_ref.at[pl.ds(0, nrows), :]
            copies = []
            for r in range(repeat):  # static unroll: one DMA per replica
                dst = o_ref.at[pl.ds(r * rows + off, nrows), :]
                cp = pltpu.make_async_copy(src, dst, sem.at[r])
                cp.start()
                copies.append(cp)
            # Drain before returning so the pipeliner may safely reuse/overwrite the
            # input block.  The DMAs run concurrently with each other and with the
            # BlockSpec prefetch of block i+1.
            for cp in copies:
                cp.wait()

        if tail == 0:
            fan_out(row_tile)
        else:
            @pl.when(i < n_full)
            def _():
                fan_out(row_tile)

            @pl.when(i == n_full)
            def _():
                fan_out(tail)  # ragged last tile: only the valid rows are written

    return kernel


def constant_forward(t: jax.Array,
                     repeat: int = CONSTANTS.BATCH_DIM_CAT_VAR_CONST,
                     *,
                     tile_bytes: int = _TILE_BYTES,
                     min_pallas_out_bytes: int = _XLA_FASTPATH_OUT_BYTES) -> jax.Array:
    """Equivalent of Constant(t).forward() == torch.cat([t] * repeat, dim=0)."""
    if t.ndim == 0:
        raise ValueError("zero-dimensional tensors cannot be concatenated")
    if repeat < 1:
        raise ValueError("repeat must be >= 1 (torch.cat of an empty list is undefined)")
    if repeat == 1:
        # cat([t] * 1, dim=0) is the identity: no kernel launch, no HBM traffic.
        return t

    shape = t.shape
    total = math.prod(shape)
    itemsize = jnp.dtype(t.dtype).itemsize
    out_shape = (shape[0] * repeat,) + shape[1:]
    out_bytes = repeat * total * itemsize

    cols = _pick_lane_cols(total)
    if total == 0 or cols is None or out_bytes <= min_pallas_out_bytes:
        # Tiny constants (fixed launch overhead dominates) or element counts that are
        # not a multiple of 128 lanes go through XLA's fused copy.
        # TODO(synk): add a masked-store Pallas path for non-128-multiple totals.
        reps = (repeat,) + (1,) * (t.ndim - 1)
        return jnp.tile(t, reps)

    rows = total // cols
    row_tile = _pick_row_tile(rows, cols, itemsize, tile_bytes)
    n_full, tail = divmod(rows, row_tile)
    n_tiles = n_full + (1 if tail else 0)

    # Lane-dense, metadata-only 2-D view of the flat constant.
    t2 = t.reshape(rows, cols)

    out2 = pl.pallas_call(
        _make_fanout_kernel(repeat, rows, row_tile, n_full, tail),
        out_shape=jax.ShapeDtypeStruct((repeat * rows, cols), t.dtype),
        grid=(n_tiles,),
        in_specs=[pl.BlockSpec((row_tile, cols), lambda i: (i, 0))],
        out_specs=pl.BlockSpec(memory_space=pl.ANY),
        scratch_shapes=[pltpu.SemaphoreType.DMA((repeat,))],
        compiler_params=pltpu.CompilerParams(
            # Manual DMAs carry no cross-step state, but keep the axis sequential for
            # safety; the kernel is HBM-bound so megacore sharding would not help.
            dimension_semantics=("arbitrary",),
            vmem_limit_bytes=_VMEM_LIMIT_BYTES,
        ),
        cost_estimate=pl.CostEstimate(
            flops=0,
            transcendentals=0,
            bytes_accessed=(1 + repeat) * total * itemsize,
        ),
    )(t2)

    # (repeat * rows, cols) row-major flattens exactly to cat along dim 0.
    return out2.reshape(out_shape)


if __name__ == "__main__":
    key = jax.random.PRNGKey(0)
    k1, k2, k3 = jax.random.split(key, 3)

    # 1) Default module semantics (BATCH_DIM_CAT_VAR_CONST == 1): identity short-circuit.
    t_small = jax.random.normal(k1, (2, 4, 16, 16), dtype=jnp.float32)
    out = jax.block_until_ready(constant_forward(t_small))
    ref = jnp.concatenate([t_small] * CONSTANTS.BATCH_DIM_CAT_VAR_CONST, axis=0)
    assert out.shape == ref.shape and out.dtype == ref.dtype
    assert bool(jnp.array_equal(out, ref)), "repeat=1 mismatch"

    # 2) Tiny constant, repeat > 1: XLA fast path (launch overhead dominated).
    out = jax.block_until_ready(constant_forward(t_small, repeat=3))
    ref = jnp.concatenate([t_small] * 3, axis=0)
    assert out.shape == ref.shape and bool(jnp.array_equal(out, ref)), "fast path mismatch"

    # 3) Pallas fan-out kernel, single-tile path (default 8 MiB tile).
    t_mid = jax.random.normal(k2, (8, 4, 64, 64), dtype=jnp.float32)
    out = jax.block_until_ready(
        constant_forward(t_mid, repeat=2, min_pallas_out_bytes=0))
    ref = jnp.concatenate([t_mid] * 2, axis=0)
    assert out.shape == ref.shape and bool(jnp.array_equal(out, ref)), "single-tile mismatch"

    # 4) Pallas fan-out kernel, multi-tile + ragged-tail path (small tile override).
    t_tail = jax.random.normal(k3, (5, 4, 32, 32), dtype=jnp.float32)
    out = jax.block_until_ready(
        constant_forward(t_tail, repeat=3, min_pallas_out_bytes=0, tile_bytes=32 * 1024))
    ref = jnp.concatenate([t_tail] * 3, axis=0)
    assert out.shape == ref.shape and bool(jnp.array_equal(out, ref)), "multi-tile mismatch"

    # 5) Same, bf16 (sublane packing = 16).
    t_bf16 = t_tail.astype(jnp.bfloat16)
    out = jax.block_until_ready(
        constant_forward(t_bf16, repeat=3, min_pallas_out_bytes=0, tile_bytes=32 * 1024))
    ref = jnp.concatenate([t_bf16] * 3, axis=0)
    assert out.shape == ref.shape and out.dtype == ref.dtype
    assert bool(jnp.array_equal(out, ref)), "bf16 mismatch"

    # 6) Element count not a multiple of 128: XLA fallback path.
    t_odd = jax.random.normal(k1, (3, 5), dtype=jnp.float32)
    out = jax.block_until_ready(constant_forward(t_odd, repeat=2, min_pallas_out_bytes=0))
    ref = jnp.concatenate([t_odd] * 2, axis=0)
    assert out.shape == ref.shape and bool(jnp.array_equal(out, ref)), "fallback mismatch"

    print("KERNEL_OK")
</pallas_src>

<mosaic_0001>
module attributes {stable_mosaic.version = 11 : i64} {
  func.func @kernel(%arg0: i32, %arg1: memref<128x1024xf32, #tpu.memory_space<vmem>>, %arg2: memref<256x1024xf32, #tpu.memory_space<any>>, %arg3: memref<2x!tpu.dma_semaphore, #tpu.memory_space<semaphore_mem>>) attributes {dimension_semantics = [#tpu.dimension_semantics<arbitrary>], iteration_bounds = array<i64: 1>, scalar_prefetch = 0 : i64, scratch_operands = 1 : i64, tpu.core_type = #tpu.core_type<tc>, window_params = [{transform_indices = @transform_0, window_bounds = array<i64: 128, 1024>}, {}]} {
    %c128_i32 = arith.constant 128 : i32
    %0 = arith.muli %arg0, %c128_i32 : i32
    %1 = tpu.assume_multiple %0, 128 : i32
    %c0_i32 = arith.constant 0 : i32
    %2 = arith.addi %c0_i32, %1 : i32
    %c0_i32_0 = arith.constant 0 : i32
    %c0_i32_1 = arith.constant 0 : i32
    %c0_i32_2 = arith.constant 0 : i32
    %3 = tpu.memref_slice %arg1[%c0_i32_1, %c0_i32_2] : memref<128x1024xf32, #tpu.memory_space<vmem>> -> memref<128x1024xf32, #tpu.memory_space<vmem>>
    %c0_i32_3 = arith.constant 0 : i32
    %4 = tpu.memref_slice %arg2[%2, %c0_i32_3] : memref<256x1024xf32, #tpu.memory_space<any>> -> memref<128x1024xf32, #tpu.memory_space<any>>
    %5 = tpu.memref_slice %arg3[%c0_i32_0] : memref<2x!tpu.dma_semaphore, #tpu.memory_space<semaphore_mem>> -> memref<1x!tpu.dma_semaphore, #tpu.memory_space<semaphore_mem>>
    %6 = tpu.memref_squeeze %5 : memref<1x!tpu.dma_semaphore, #tpu.memory_space<semaphore_mem>> -> memref<!tpu.dma_semaphore, #tpu.memory_space<semaphore_mem>>
    tpu.enqueue_dma source(%3 : memref<128x1024xf32, #tpu.memory_space<vmem>>) target(%4 : memref<128x1024xf32, #tpu.memory_space<any>>) target_semaphore(%6 : memref<!tpu.dma_semaphore, #tpu.memory_space<semaphore_mem>>)
    %c128_i32_4 = arith.constant 128 : i32
    %7 = arith.addi %c128_i32_4, %1 : i32
    %c1_i32 = arith.constant 1 : i32
    %c0_i32_5 = arith.constant 0 : i32
    %c0_i32_6 = arith.constant 0 : i32
    %8 = tpu.memref_slice %arg1[%c0_i32_5, %c0_i32_6] : memref<128x1024xf32, #tpu.memory_space<vmem>> -> memref<128x1024xf32, #tpu.memory_space<vmem>>
    %c0_i32_7 = arith.constant 0 : i32
    %9 = tpu.memref_slice %arg2[%7, %c0_i32_7] : memref<256x1024xf32, #tpu.memory_space<any>> -> memref<128x1024xf32, #tpu.memory_space<any>>
    %10 = tpu.memref_slice %arg3[%c1_i32] : memref<2x!tpu.dma_semaphore, #tpu.memory_space<semaphore_mem>> -> memref<1x!tpu.dma_semaphore, #tpu.memory_space<semaphore_mem>>
    %11 = tpu.memref_squeeze %10 : memref<1x!tpu.dma_semaphore, #tpu.memory_space<semaphore_mem>> -> memref<!tpu.dma_semaphore, #tpu.memory_space<semaphore_mem>>
    tpu.enqueue_dma source(%8 : memref<128x1024xf32, #tpu.memory_space<vmem>>) target(%9 : memref<128x1024xf32, #tpu.memory_space<any>>) target_semaphore(%11 : memref<!tpu.dma_semaphore, #tpu.memory_space<semaphore_mem>>)
    %c0_i32_8 = arith.constant 0 : i32
    %c0_i32_9 = arith.constant 0 : i32
    %c0_i32_10 = arith.constant 0 : i32
    %12 = tpu.memref_slice %arg1[%c0_i32_9, %c0_i32_10] : memref<128x1024xf32, #tpu.memory_space<vmem>> -> memref<128x1024xf32, #tpu.memory_space<vmem>>
    %c0_i32_11 = arith.constant 0 : i32
    %13 = tpu.memref_slice %arg2[%2, %c0_i32_11] : memref<256x1024xf32, #tpu.memory_space<any>> -> memref<128x1024xf32, #tpu.memory_space<any>>
    %14 = tpu.memref_slice %arg3[%c0_i32_8] : memref<2x!tpu.dma_semaphore, #tpu.memory_space<semaphore_mem>> -> memref<1x!tpu.dma_semaphore, #tpu.memory_space<semaphore_mem>>
    %15 = tpu.memref_squeeze %14 : memref<1x!tpu.dma_semaphore, #tpu.memory_space<semaphore_mem>> -> memref<!tpu.dma_semaphore, #tpu.memory_space<semaphore_mem>>
    tpu.wait_dma2 semaphore(%15 : memref<!tpu.dma_semaphore, #tpu.memory_space<semaphore_mem>>) src(%12 : memref<128x1024xf32, #tpu.memory_space<vmem>>) dst(%13 : memref<128x1024xf32, #tpu.memory_space<any>>)
    %c1_i32_12 = arith.constant 1 : i32
    %c0_i32_13 = arith.constant 0 : i32
    %c0_i32_14 = arith.constant 0 : i32
    %16 = tpu.memref_slice %arg1[%c0_i32_13, %c0_i32_14] : memref<128x1024xf32, #tpu.memory_space<vmem>> -> memref<128x1024xf32, #tpu.memory_space<vmem>>
    %c0_i32_15 = arith.constant 0 : i32
    %17 = tpu.memref_slice %arg2[%7, %c0_i32_15] : memref<256x1024xf32, #tpu.memory_space<any>> -> memref<128x1024xf32, #tpu.memory_space<any>>
    %18 = tpu.memref_slice %arg3[%c1_i32_12] : memref<2x!tpu.dma_semaphore, #tpu.memory_space<semaphore_mem>> -> memref<1x!tpu.dma_semaphore, #tpu.memory_space<semaphore_mem>>
    %19 = tpu.memref_squeeze %18 : memref<1x!tpu.dma_semaphore, #tpu.memory_space<semaphore_mem>> -> memref<!tpu.dma_semaphore, #tpu.memory_space<semaphore_mem>>
    tpu.wait_dma2 semaphore(%19 : memref<!tpu.dma_semaphore, #tpu.memory_space<semaphore_mem>>) src(%16 : memref<128x1024xf32, #tpu.memory_space<vmem>>) dst(%17 : memref<128x1024xf32, #tpu.memory_space<any>>)
    return
  }
  func.func @transform_0(%arg0: i32) -> (i32, i32) {
    %c0_i32 = arith.constant 0 : i32
    %c0_i32_0 = arith.constant 0 : i32
    return %arg0, %c0_i32 : i32, i32
  }
}

</mosaic_0001>

<bundles_post_ra>
// kernel: tpu_custom_call.1
= control target key start
LH: loop header
LB: loop body
LE: loop exit
PB: predicated region body
PF: predicated region fallthrough
CT: control target
= control target key end

     0   :  { %6 = vsyncpa [#allocation4], 0  ;;  %s161_s6 = smov [#allocation3]   ;;  %s220_s0 = inlined_call_operand.hbm [shape: f32[128,1024], index: 0, kind: input, shape index: {}]   ;;  %s221_s1 = inlined_call_operand.hbm [shape: f32[256,1024], index: 1, kind: output, shape index: {}]  }
   0x1   :  { %s12_s7 = sshll.u32 %s161_s6, 4  ;;  %s86_s10 = scalar_lea.hbm %s220_s0, 16384  ;;  %s174_s7 = int_to_ptr.vmem [resolvable:$true] %s12_s7 }
   0x2   :  { %p87_p0 = scmp.ne.s32.totalorder %s220_s0, %s86_s10  ;;  %p90_p1 = scmp.lt.u32.totalorder %s86_s10, %s220_s0 }
   0x4   :  { %p92_p2 = pnand %p90_p1, %p87_p0 }
   0x6   :  { %95 = shalt.err (!%p92_p2)
}
   0x7   :  { %s96_s15 = scalar_lea.vmem %s174_s7, 16384  ;;  %p101_p4 = scmp.lt.s32.totalorder %s174_s7, %s174_s7 }
   0x8   :  { %p97_p3 = scmp.ne.s32.totalorder %s174_s7, %s96_s15  ;;  %p102_p5 = scmp.lt.s32.totalorder %s96_s15, %s96_s15 }
   0xa   :  { %p103_p6 = por %p102_p5, %p101_p4 }
   0xc   :  { %p189_p7 = pnand %p103_p6, %p97_p3 }
   0xe   :  { %107 = shalt.err (!%p189_p7)
}
   0xf   :  { %s162_s17 = smov 1024   ;;  %s163_s18 = smov 64  }
  0x10   :  { %18 = dma.hbm_to_vmem [thread:$0]  %s220_s0, 16384, %s174_s7, [#allocation4], %s162_s17, %s162_s17, %s163_s18  }
  0x11   :  { %155 = dma.done.wait [#allocation4], 16384  }
  0x12   :  { %156 = vsyncadd [#allocation4], 4294950912  ;;  %s44_s23 = scalar_lea.hbm %s221_s1, 16384 }
  0x13   :  { %119 = shalt.err (!%p189_p7)  }
  0x14   :  { %p121_p8 = scmp.ne.s32.totalorder %s221_s1, %s44_s23  ;;  %s122_s28 = scalar_lea.hbm %s221_s1, 32768 }
  0x15   :  { %p123_p9 = scmp.lt.u32.totalorder %s122_s28, %s44_s23  ;;  %p124_p10 = scmp.lt.u32.totalorder %s44_s23, %s221_s1 }
  0x17   :  { %p125_p11 = por %p124_p10, %p123_p9 }
  0x19   :  { %p126_p12 = pnand %p125_p11, %p121_p8 }
  0x1b   :  { %129 = shalt.err (!%p126_p12)  }
  0x1c   :  { %38 = dma.vmem_to_hbm [thread:$0]  %s174_s7, 16384, %s221_s1, [#allocation2] }
  0x1d   :  { %141 = shalt.err (!%p189_p7)  }
  0x1e   :  { %p143_p13 = scmp.ne.s32.totalorder %s44_s23, %s122_s28  ;;  %p146_p0 = scmp.lt.u32.totalorder %s122_s28, %s122_s28 }
  0x20   :  { %p147_p1 = por %p146_p0, %p124_p10 }
  0x22   :  { %p149_p2 = por %p147_p1, %p123_p9 }
  0x24   :  { %p150_p3 = pnand %p149_p2, %p143_p13 }
  0x26   :  { %153 = shalt.err (!%p150_p3)  }
  0x27   :  { %56 = dma.vmem_to_hbm [thread:$0]  %s174_s7, 16384, %s44_s23, [#allocation2 + $0x1] }
  0x28   :  { %157 = dma.done.wait [#allocation2], 16384 }
  0x29   :  { %158 = vsyncadd [#allocation2], 4294950912 }
  0x2a   :  { %159 = dma.done.wait [#allocation2 + $0x1], 16384 }
  0x2b   :  { %160 = vsyncadd [#allocation2 + $0x1], 4294950912 }
  0x2c   :  { %63 = vsyncpa [#allocation4], 1 }
  0x2d   :  { %64 = vsyncmov [#allocation2] }
  0x30   :  { %s65_s3 = vpop.sfrf %64 }
  0x31   :  { %p81_p4 = scmp.ne.s32.totalorder %s65_s3, 0 }
  0x33   :  { %69 = shalt.err (%p81_p4)  }
  0x34   :  { %71 = vsyncmov [#allocation2 + $0x1] }
  0x37   :  { %s72_s1 = vpop.sfrf %71 }
  0x38   :  { %p82_p5 = scmp.ne.s32.totalorder %s72_s1, 0 }
  0x3a   :  { %76 = shalt.err (%p82_p5)  }

</bundles_post_ra>
